<compile_context>
chip_gen: v7x
topology: tpu7x:2x2x1
jax: 0.10.0
libtpu: 0.0.40
codegen_flags: <defaults>
</compile_context>

<pallas_src>
import functools

import numpy as np

import jax
import jax.numpy as jnp
from jax.experimental import pallas as pl
from jax.experimental.pallas import tpu as pltpu


def _round_up(x, m):
    return (x + m - 1) // m * m


def _fsq_kernel(z_ref, consts_ref, basis_sel_ref, codes_ref, idx_ref):
    """One (TN, D) row block: element-wise quantize + grouped index reduction."""
    z = z_ref[...].astype(jnp.float32)                 # (TN, D)

    shift = consts_ref[0:1, :]                         # (1, D) per-lane constants
    half_l = consts_ref[1:2, :]
    offset = consts_ref[2:3, :]
    half_width = consts_ref[3:4, :]

    bounded = jnp.tanh(z + shift) * half_l - offset    # EUP tanh, VPU mul/add
    q = jnp.round(bounded)                             # half-to-even == torch.round
    codes_ref[...] = (q / half_width).astype(codes_ref.dtype)

    # Per-group codebook index: sum_c (q_c + half_width_c) * basis_c, written as a
    # single lane-dense matmul against the constant block-diagonal basis matrix.
    scaled = q + half_width                            # integer-valued f32 in [0, L_c-1]
    idx_f = jnp.dot(scaled, basis_sel_ref[...],
                    preferred_element_type=jnp.float32)  # exact while prod(levels) < 2**24
    idx_ref[...] = jnp.round(idx_f).astype(jnp.int32)


@functools.partial(jax.jit, static_argnames=("levels", "row_block"))
def fsq_forward(z, levels, row_block=256):
    """FSQ forward. z: (..., D) with D % len(levels) == 0. Returns the module's dict."""
    levels = tuple(int(l) for l in levels)
    C = len(levels)
    D = z.shape[-1]
    if D % C != 0:
        raise ValueError(f"last dim {D} not divisible by num_channels {C}")
    G = D // C
    lead = z.shape[:-1]
    N = int(np.prod(lead)) if lead else 1

    # ---- trace-time (numpy) constants --------------------------------------
    lv = np.asarray(levels, np.float64)
    eps = 1e-3
    half_l = (lv - 1.0) * (1.0 + eps) / 2.0
    offset = np.where(np.asarray(levels) % 2 == 0, 0.5, 0.0)
    shift = np.arctanh(offset / half_l)
    half_width = (np.asarray(levels, np.int64) // 2).astype(np.float64)
    basis = np.concatenate(
        ([1.0], np.cumprod(np.asarray(levels[:-1], np.float64))))   # (C,)

    def tile_d(v):  # tile per-channel constant across the flat feature axis
        return np.tile(np.asarray(v, np.float32), G)[None, :]       # (1, D)

    consts = np.concatenate(
        [tile_d(shift), tile_d(half_l), tile_d(offset), tile_d(half_width)],
        axis=0).astype(np.float32)                                  # (4, D)

    basis_sel = np.zeros((D, G), np.float32)                        # block-diag basis
    for g in range(G):
        basis_sel[g * C:(g + 1) * C, g] = basis

    # ---- flatten batch, pick a row tile -------------------------------------
    z2 = z.reshape(N, D)
    tn = min(int(row_block), _round_up(N, 8))
    n_pad = _round_up(N, tn)
    if n_pad != N:
        z2 = jnp.pad(z2, ((0, n_pad - N), (0, 0)))

    itemsize = z.dtype.itemsize
    flops = n_pad * D * 8 + 2 * n_pad * D * G
    bytes_accessed = (n_pad * D * 2 * itemsize + n_pad * G * 4
                      + (consts.size + basis_sel.size) * 4)

    codes2, idx2 = pl.pallas_call(
        _fsq_kernel,
        out_shape=(
            jax.ShapeDtypeStruct((n_pad, D), z.dtype),
            jax.ShapeDtypeStruct((n_pad, G), jnp.int32),
        ),
        grid=(n_pad // tn,),
        in_specs=[
            pl.BlockSpec((tn, D), lambda i: (i, 0)),   # z rows
            pl.BlockSpec((4, D), lambda i: (0, 0)),    # per-lane constants (tiny)
            pl.BlockSpec((D, G), lambda i: (0, 0)),    # basis/selector matrix (tiny)
        ],
        out_specs=(
            pl.BlockSpec((tn, D), lambda i: (i, 0)),   # codes (lane-dense slab)
            pl.BlockSpec((tn, G), lambda i: (i, 0)),   # indices
        ),
        compiler_params=pltpu.CompilerParams(
            dimension_semantics=("parallel",),         # independent rows -> 2 TCs on v7x
        ),
        cost_estimate=pl.CostEstimate(
            flops=int(flops),
            transcendentals=int(n_pad * D),
            bytes_accessed=int(bytes_accessed),
        ),
    )(z2, jnp.asarray(consts), jnp.asarray(basis_sel))

    codes_flat = codes2[:N].reshape(*lead, D)
    codes = codes_flat.reshape(*lead, G, C)
    indices = idx2[:N].reshape(*lead, G)               # note: int32 (torch uses int64)
    z_grouped = z.reshape(*lead, G, C)

    return {
        'codes': codes,
        'codes_flat': codes_flat,
        'indices': indices,
        'z': z_grouped,
        'state': codes_flat,
    }


def reference_fsq(z, levels):
    """Pure-JAX reference reproducing the canonical FSQ forward."""
    levels = tuple(int(l) for l in levels)
    C = len(levels)
    lead = z.shape[:-1]
    G = z.shape[-1] // C
    zz = z.reshape(*lead, G, C).astype(jnp.float32)

    lv = jnp.asarray(levels, jnp.float32)
    eps = 1e-3
    half_l = (lv - 1.0) * (1.0 + eps) / 2.0
    offset = jnp.where(jnp.asarray(levels) % 2 == 0, 0.5, 0.0)
    shift = jnp.arctanh(offset / half_l)
    half_width = jnp.asarray([l // 2 for l in levels], jnp.float32)
    basis = jnp.asarray(
        np.concatenate(([1.0], np.cumprod(np.asarray(levels[:-1], np.float64)))),
        jnp.float32)

    q = jnp.round(jnp.tanh(zz + shift) * half_l - offset)
    codes = q / half_width
    indices = jnp.sum((q + half_width) * basis, axis=-1).astype(jnp.int32)
    return codes, indices


if __name__ == "__main__":
    levels = (8, 5, 5, 5)           # C = 4 channels, codebook size 1000
    B, S, D = 2, 8, 32              # z: (batch=2, seq=8, hidden=32) -> G = 8 groups
    C = len(levels)
    G = D // C

    key = jax.random.PRNGKey(0)
    z = jax.random.normal(key, (B, S, D), dtype=jnp.float32)

    out = fsq_forward(z, levels)
    out = jax.block_until_ready(out)

    ref_codes, ref_idx = reference_fsq(z, levels)

    assert out['codes'].shape == (B, S, G, C), out['codes'].shape
    assert out['codes_flat'].shape == (B, S, D), out['codes_flat'].shape
    assert out['indices'].shape == (B, S, G), out['indices'].shape
    assert out['z'].shape == (B, S, G, C), out['z'].shape
    assert out['state'].shape == (B, S, D), out['state'].shape

    assert jnp.allclose(out['codes'], ref_codes, atol=1e-5, rtol=1e-5), \
        float(jnp.max(jnp.abs(out['codes'] - ref_codes)))
    assert jnp.allclose(out['codes_flat'], ref_codes.reshape(B, S, D), atol=1e-5, rtol=1e-5)
    assert jnp.array_equal(out['indices'], ref_idx)
    assert jnp.allclose(out['z'], z.reshape(B, S, G, C))
    assert jnp.allclose(out['state'], out['codes_flat'])

    print("KERNEL_OK")
</pallas_src>

<mosaic_0001>
module attributes {stable_mosaic.version = 11 : i64} {
  func.func @_fsq_kernel(%arg0: i32, %arg1: memref<16x32xf32, #tpu.memory_space<vmem>>, %arg2: memref<4x32xf32, #tpu.memory_space<vmem>>, %arg3: memref<32x8xf32, #tpu.memory_space<vmem>>, %arg4: memref<16x32xf32, #tpu.memory_space<vmem>>, %arg5: memref<16x8xi32, #tpu.memory_space<vmem>>) attributes {dimension_semantics = [#tpu.dimension_semantics<parallel>], iteration_bounds = array<i64: 1>, scalar_prefetch = 0 : i64, scratch_operands = 0 : i64, tpu.core_type = #tpu.core_type<tc>, window_params = [{transform_indices = @transform_0, window_bounds = array<i64: 16, 32>}, {pipeline_mode = #tpu.pipeline_mode<synchronous>, transform_indices = @transform_1, window_bounds = array<i64: 4, 32>}, {pipeline_mode = #tpu.pipeline_mode<synchronous>, transform_indices = @transform_2, window_bounds = array<i64: 32, 8>}, {transform_indices = @transform_3, window_bounds = array<i64: 16, 32>}, {transform_indices = @transform_4, window_bounds = array<i64: 16, 8>}]} {
    %c0 = arith.constant 0 : index
    %c0_0 = arith.constant 0 : index
    %0 = vector.load %arg1[%c0, %c0_0] : memref<16x32xf32, #tpu.memory_space<vmem>>, vector<16x32xf32>
    %c0_1 = arith.constant 0 : index
    %c0_2 = arith.constant 0 : index
    %1 = vector.load %arg2[%c0_1, %c0_2] : memref<4x32xf32, #tpu.memory_space<vmem>>, vector<1x32xf32>
    %c1 = arith.constant 1 : index
    %c0_3 = arith.constant 0 : index
    %2 = vector.load %arg2[%c1, %c0_3] : memref<4x32xf32, #tpu.memory_space<vmem>>, vector<1x32xf32>
    %c2 = arith.constant 2 : index
    %c0_4 = arith.constant 0 : index
    %3 = vector.load %arg2[%c2, %c0_4] : memref<4x32xf32, #tpu.memory_space<vmem>>, vector<1x32xf32>
    %c3 = arith.constant 3 : index
    %c0_5 = arith.constant 0 : index
    %4 = vector.load %arg2[%c3, %c0_5] : memref<4x32xf32, #tpu.memory_space<vmem>>, vector<1x32xf32>
    %5 = vector.broadcast %1 : vector<1x32xf32> to vector<16x32xf32>
    %6 = arith.addf %0, %5 : vector<16x32xf32>
    %7 = math.tanh %6 : vector<16x32xf32>
    %8 = vector.broadcast %2 : vector<1x32xf32> to vector<16x32xf32>
    %9 = arith.mulf %7, %8 : vector<16x32xf32>
    %10 = vector.broadcast %3 : vector<1x32xf32> to vector<16x32xf32>
    %11 = arith.subf %9, %10 : vector<16x32xf32>
    %12 = math.roundeven %11 : vector<16x32xf32>
    %13 = vector.broadcast %4 : vector<1x32xf32> to vector<16x32xf32>
    %14 = arith.divf %12, %13 : vector<16x32xf32>
    %c0_6 = arith.constant 0 : index
    %c0_7 = arith.constant 0 : index
    %15 = vector.load %arg4[%c0_6, %c0_7] : memref<16x32xf32, #tpu.memory_space<vmem>>, vector<16x32xf32>
    tpu.vector_store %arg4[%c0_6, %c0_7], %14 {strides = array<i32>} : memref<16x32xf32, #tpu.memory_space<vmem>>, vector<16x32xf32>,
    %16 = vector.broadcast %4 : vector<1x32xf32> to vector<16x32xf32>
    %17 = arith.addf %12, %16 : vector<16x32xf32>
    %c0_8 = arith.constant 0 : index
    %c0_9 = arith.constant 0 : index
    %18 = vector.load %arg3[%c0_8, %c0_9] : memref<32x8xf32, #tpu.memory_space<vmem>>, vector<32x8xf32>
    %cst = arith.constant dense<0.000000e+00> : vector<16x8xf32>
    %19 = tpu.matmul %17, %18, %cst {dimension_numbers = #tpu.dot_dimension_numbers<[1], [0], [0], [1], [0, 0, 1, 1], [], []>} : vector<16x32xf32>, vector<32x8xf32>, vector<16x8xf32> -> vector<16x8xf32>
    %20 = math.roundeven %19 : vector<16x8xf32>
    %21 = arith.fptosi %20 : vector<16x8xf32> to vector<16x8xi32>
    %c0_10 = arith.constant 0 : index
    %c0_11 = arith.constant 0 : index
    %22 = vector.load %arg5[%c0_10, %c0_11] : memref<16x8xi32, #tpu.memory_space<vmem>>, vector<16x8xi32>
    tpu.vector_store %arg5[%c0_10, %c0_11], %21 {strides = array<i32>} : memref<16x8xi32, #tpu.memory_space<vmem>>, vector<16x8xi32>,
    return
  }
  func.func @transform_0(%arg0: i32) -> (i32, i32) {
    %c0_i32 = arith.constant 0 : i32
    %c0_i32_0 = arith.constant 0 : i32
    return %arg0, %c0_i32 : i32, i32
  }
  func.func @transform_1(%arg0: i32) -> (i32, i32) {
    %c0_i32 = arith.constant 0 : i32
    %c0_i32_0 = arith.constant 0 : i32
    %c0_i32_1 = arith.constant 0 : i32
    return %c0_i32, %c0_i32_0 : i32, i32
  }
  func.func @transform_2(%arg0: i32) -> (i32, i32) {
    %c0_i32 = arith.constant 0 : i32
    %c0_i32_0 = arith.constant 0 : i32
    %c0_i32_1 = arith.constant 0 : i32
    return %c0_i32, %c0_i32_0 : i32, i32
  }
  func.func @transform_3(%arg0: i32) -> (i32, i32) {
    %c0_i32 = arith.constant 0 : i32
    %c0_i32_0 = arith.constant 0 : i32
    return %arg0, %c0_i32 : i32, i32
  }
  func.func @transform_4(%arg0: i32) -> (i32, i32) {
    %c0_i32 = arith.constant 0 : i32
    %c0_i32_0 = arith.constant 0 : i32
    return %arg0, %c0_i32 : i32, i32
  }
}

</mosaic_0001>

<bundles_post_ra>
// kernel: fsq_forward.1
= control target key start
LH: loop header
LB: loop body
LE: loop exit
PB: predicated region body
PF: predicated region fallthrough
CT: control target
= control target key end

     0   :  { %10 = vsyncpa [#allocation3], 0  ;;  %s412_s0 = inlined_call_operand.hbm [shape: f32[16,32], index: 0, kind: input, shape index: {}]   ;;  %s413_s1 = inlined_call_operand.vmem [shape: f32[4,32], index: 1, kind: input, shape index: {}]   ;;  %s414_s2 = inlined_call_operand.hbm [shape: f32[32,8], index: 2, kind: input, shape index: {}]   ;;  %s415_s3 = inlined_call_operand.vmem [shape: f32[16,32], index: 3, kind: output, shape index: {0}]   ;;  %s416_s4 = inlined_call_operand.hbm [shape: s32[16,8], index: 4, kind: output, shape index: {1}]  }
   0x1   :  { %11 = vsyncpa [#allocation6], 0 }
   0x2   :  { %12 = vsyncpa [#allocation4], 0  ;;  %s319_s15 = smov [#allocation2]   ;;  %s247_s19 = scalar_lea.hbm %s412_s0, 256 }
   0x3   :  { %s18_s16 = sshll.u32 %s319_s15, 4  ;;  %p248_p0 = scmp.ne.s32.totalorder %s412_s0, %s247_s19  ;;  %s19_s16 = int_to_ptr.vmem [resolvable:$true] %s18_s16 }
   0x4   :  { %p251_p1 = scmp.lt.u32.totalorder %s247_s19, %s412_s0 }
   0x6   :  { %p253_p2 = pnand %p251_p1, %p248_p0 }
   0x8   :  { %256 = shalt.err (!%p253_p2)
}
   0x9   :  { %s257_s24 = scalar_lea.vmem %s19_s16, 256  ;;  %p262_p4 = scmp.lt.s32.totalorder %s19_s16, %s19_s16 }
   0xa   :  { %p258_p3 = scmp.ne.s32.totalorder %s19_s16, %s257_s24  ;;  %p263_p5 = scmp.lt.s32.totalorder %s257_s24, %s257_s24 }
   0xc   :  { %p264_p6 = por %p263_p5, %p262_p4 }
   0xe   :  { %p265_p7 = pnand %p264_p6, %p258_p3 }
  0x10   :  { %268 = shalt.err (!%p265_p7)
}
  0x11   :  { %s320_s25 = smov 128   ;;  %s321_s26 = smov 8  }
  0x12   :  { %24 = dma.hbm_to_vmem [thread:$0]  %s412_s0, 256, %s19_s16, [#allocation3], %s320_s25, %s320_s25, %s321_s26  }
  0x13   :  { %s322_s29 = smov [#allocation5]   ;;  %s269_s7 = scalar_lea.hbm %s414_s2, 512 }
  0x14   :  { %s32_s30 = sshll.u32 %s322_s29, 4  ;;  %p270_p8 = scmp.ne.s32.totalorder %s414_s2, %s269_s7  ;;  %s33_s30 = int_to_ptr.vmem [resolvable:$true] %s32_s30 }
  0x15   :  { %p273_p9 = scmp.lt.u32.totalorder %s269_s7, %s414_s2 }
  0x17   :  { %p275_p10 = pnand %p273_p9, %p270_p8 }
  0x19   :  { %278 = shalt.err (!%p275_p10)
}
  0x1a   :  { %s279_s12 = scalar_lea.vmem %s33_s30, 512  ;;  %p284_p12 = scmp.lt.s32.totalorder %s33_s30, %s33_s30 }
  0x1b   :  { %p280_p11 = scmp.ne.s32.totalorder %s33_s30, %s279_s12  ;;  %p285_p13 = scmp.lt.s32.totalorder %s279_s12, %s279_s12 }
  0x1d   :  { %p286_p0 = por %p285_p13, %p284_p12 }
  0x1f   :  { %p287_p1 = pnand %p286_p0, %p280_p11 }
  0x21   :  { %290 = shalt.err (!%p287_p1)
}
  0x22   :  { %38 = dma.hbm_to_vmem [thread:$0]  %s414_s2, 512, %s33_s30, [#allocation6], %s320_s25, %s320_s25, %s321_s26  }
  0x23   :  { %313 = dma.done.wait [#allocation3], 256  }
  0x24   :  { %314 = vsyncadd [#allocation3], 4294967040 }
  0x25   :  { %315 = dma.done.wait [#allocation6], 512  }
  0x26   :  { %316 = vsyncadd [#allocation6], 4294966784  ;;  %v85_v0 = vld [vmem:[#allocation5] sm:$0xff]  ;;  %v86_v1 = vld [vmem:[#allocation5 + $0x8] sm:$0xff]  ;;  %vm80_vm0 = vcmask 261120   ;;  %s323_s24 = smov [#allocation7]  }
  0x27   :  { %v87_v2 = vld [vmem:[#allocation5 + $0x10] sm:$0xff]  ;;  %v220_v3 = vpack.c.bf16 %v86_v1, %v85_v0  ;;  %v88_v4 = vld [vmem:[#allocation5 + $0x18] sm:$0xff]  ;;  %s182_s27 = sshll.u32 %s323_s24, 4  ;;  %vm172_vm1 = vcmask 64512   ;;  %s183_s27 = int_to_ptr.vmem [resolvable:$true] %s182_s27 }
  0x28   :  { %v45_v5 = vld [vmem:[#allocation2] sm:$0xff]  ;;  %v46_v6 = vld [vmem:[#allocation2 + $0x8] sm:$0xff]  ;;  %v224_v7 = vpack.c.bf16 %v88_v4, %v87_v2  ;;  %s291_s28 = scalar_lea.vmem %s183_s27, 256  ;;  %p296_p3 = scmp.lt.s32.totalorder %s183_s27, %s183_s27 }
  0x29   :  { %v197_v8 = vld [vmem:[%s413_s1] ss:$0 sm:$0xff]  ;;  %221 = vmatprep.subr.bf16.mxu0 %v220_v3  ;;  %v200_v11 = vld [vmem:[%s413_s1 + $0x3] ss:$0 sm:$0xff]  ;;  %v198_v12 = vld [vmem:[%s413_s1 + $0x1] ss:$0 sm:$0xff]  ;;  %p292_p2 = scmp.ne.s32.totalorder %s183_s27, %s291_s28  ;;  %p297_p4 = scmp.lt.s32.totalorder %s291_s28, %s291_s28 }
  0x2a   :  { %v55_v9 = vadd.f32 %v197_v8, %v45_v5  ;;  %v56_v10 = vadd.f32 %v197_v8, %v46_v6  ;;  %223 = vmatpush3.bf16.msra.mxu0 %v220_v3  ;;  %v199_v14 = vld [vmem:[%s413_s1 + $0x2] ss:$0 sm:$0xff] }
  0x2b   :  { %225 = vmatprep.subr.bf16.mxu0 %v224_v7  ;;  %p298_p5 = por %p297_p4, %p296_p3 }
  0x2c   :  { %241 = vtanh.f32 %v55_v9 }
  0x2d   :  { %243 = vtanh.f32 %v56_v10  ;;  %p299_p6 = pnand %p298_p5, %p292_p2 }
  0x2e   :  { %227 = vmatpush3.bf16.msra.mxu0 %v224_v7  ;;  %245 = vrcp.f32 %v200_v11 }
  0x36   :  { %v242_v13 = vpop.eup %241 }
  0x37   :  { %v244_v15 = vpop.eup %243  ;;  %v63_v16 = vmul.f32 %v242_v13, %v198_v12 }
  0x38   :  { %v64_v17 = vmul.f32 %v244_v15, %v198_v12  ;;  %v246_v19 = vpop.eup %245 }
  0x39   :  { %v69_v18 = vsub.f32 %v63_v16, %v199_v14 }
  0x3a   :  { %v70_v20 = vsub.f32 %v64_v17, %v199_v14 }
  0x3b   :  { %v228_v21 = vround.rtne.f32 %v69_v18 }
  0x3c   :  { %v229_v22 = vround.rtne.f32 %v70_v20 }
  0x3d   :  { %v78_v23 = vmul.f32 %v246_v19, %v228_v21  ;;  %v83_v24 = vadd.f32 %v228_v21, %v200_v11 }
  0x3e   :  { %v79_v25 = vmul.f32 %v246_v19, %v229_v22  ;;  %v84_v26 = vadd.f32 %v229_v22, %v200_v11 }
  0x3f   :  { %81 = vst.msk [vmem:[%s415_s3] sm:$0xff] %vm80_vm0, %v78_v23  ;;  %217 = vmatprep.mubr.msk.f32.mxu0 %vm80_vm0, %v83_v24 }
  0x40   :  { %82 = vst.msk [vmem:[%s415_s3 + $0x8] sm:$0xff] %vm80_vm0, %v79_v25  ;;  %218 = vmatmul.mubr.msk.f32.vlgmr.msra.gmra.mrb[0].mxu0 %vm80_vm0, %v84_v26 }
 0x113   :  { %v219_v27 = vpop.f32.mrb[0].mxu0 }
 0x114   :  { %v235_v28 = vcvt.f32.s32 %v219_v27  ;;  %v161_v29 = vpop.f32.mrb[1].mxu0 }
 0x115   :  { %v232_v30 = vcvt.f32.s32 %v161_v29 }
 0x116   :  { %174 = vst.msk [vmem:[#allocation7 + $0x8] sm:$0xff] %vm172_vm1, %v235_v28 }
 0x117   :  { %173 = vst.msk [vmem:[#allocation7] sm:$0xff] %vm172_vm1, %v232_v30 }
 0x118   :  { %302 = shalt.err (!%p299_p6)
}
 0x119   :  { %s303_s30 = scalar_lea.hbm %s416_s4, 256 }
 0x11a   :  { %p304_p7 = scmp.ne.s32.totalorder %s416_s4, %s303_s30  ;;  %p307_p8 = scmp.lt.u32.totalorder %s303_s30, %s416_s4 }
 0x11c   :  { %p309_p9 = pnand %p307_p8, %p304_p7 }
 0x11e   :  { %312 = shalt.err (!%p309_p9)
}
 0x11f   :  { %188 = dma.vmem_to_hbm [thread:$0]  %s183_s27, 256, %s416_s4, [#allocation4], %s320_s25, %s320_s25, %s321_s26  }
 0x120   :  { %317 = dma.done.wait [#allocation4], 256  }
 0x121   :  { %318 = vsyncadd [#allocation4], 4294967040 }
 0x122   :  { %194 = vsyncpa [#allocation3], 1 }
 0x123   :  { %195 = vsyncpa [#allocation6], 1 }
 0x124   :  { %196 = vsyncpa [#allocation4], 1 }

</bundles_post_ra>
